<compile_context>
chip_gen: v5e
topology: v5e:2x2
jax: 0.10.0
libtpu: 0.0.40
codegen_flags: <defaults>
</compile_context>

<pallas_src>
import functools

import numpy as np
import jax
import jax.numpy as jnp
from jax.experimental import pallas as pl
from jax.experimental.pallas import tpu as pltpu


def _round_up(x, m):
    return ((x + m - 1) // m) * m


# ---------------------------------------------------------------------------
# One-time probe of pltpu.roll's rotation direction (sublane axis).
# The kernel needs roll(h, s_prev)[t] == h[t-1]; probing makes the binding of
# the W[0]/W[2] taps robust to either rotate convention.
# ---------------------------------------------------------------------------
_ROLL_LIKE_JNP = None


def _roll_like_jnp():
    global _ROLL_LIKE_JNP
    if _ROLL_LIKE_JNP is None:
        def probe(x_ref, o_ref):
            o_ref[...] = pltpu.roll(x_ref[...], 1, axis=0)

        x = jnp.broadcast_to(jnp.arange(8, dtype=jnp.float32)[:, None],
                             (8, 128))
        out = pl.pallas_call(
            probe, out_shape=jax.ShapeDtypeStruct((8, 128), jnp.float32))(x)
        # jnp.roll semantics: out[0] == x[-1] == 7
        _ROLL_LIKE_JNP = bool(out[0, 0] == 7.0)
    return _ROLL_LIKE_JNP


# ---------------------------------------------------------------------------
# Kernel: one grid step = (one batch element, one T tile incl. halo)
# ---------------------------------------------------------------------------
def refine_head_kernel(x_ref, m_ref, aux_ref,
                       w1_ref, b1_ref, w2_ref, b2_ref, wh_ref, bh_ref,
                       out_ref, *, roll_like_jnp):
    tw = x_ref.shape[2]            # tile rows including halo
    tt = out_ref.shape[1]          # rows kept (written) per tile
    halo = (tw - tt) // 2

    x = x_ref[0, 0]                # (Tw, Cp)  f32
    m = m_ref[0, 0]                # (Tw, 1)   f32 sequence mask
    aux = aux_ref[0]               # (Tw, 4)   f32 [prev_ok, next_ok, scale, _]
    prev_ok = aux[:, 0:1]
    next_ok = aux[:, 1:2]
    scale_r = aux[:, 2:3]

    s_prev = 1 if roll_like_jnp else tw - 1
    s_next = tw - 1 if roll_like_jnp else 1
    mxu_dt = w1_ref.dtype          # bf16 (prod) or f32 (debug)

    def conv3(h, w_ref_, b_ref_):
        # conv1d(k=3, pad=1) as three accumulated MXU dots on XLU-rolled
        # operands.  Rows wrapped by the roll are either halo rows (outputs
        # discarded) or level seams (zeroed by prev_ok / next_ok).
        hp = pltpu.roll(h, s_prev, axis=0) * prev_ok      # h[t-1]
        hn = pltpu.roll(h, s_next, axis=0) * next_ok      # h[t+1]
        y = jnp.dot(h.astype(mxu_dt), w_ref_[1],
                    preferred_element_type=jnp.float32)
        y = y + jnp.dot(hp.astype(mxu_dt), w_ref_[0],
                        preferred_element_type=jnp.float32)
        y = y + jnp.dot(hn.astype(mxu_dt), w_ref_[2],
                        preferred_element_type=jnp.float32)
        return y + b_ref_[...]

    # two shared head layers: MaskedConv1D -> Identity norm -> ReLU   (f32)
    h = jnp.maximum(conv3(x, w1_ref, b1_ref) * m, 0.0)
    h = jnp.maximum(conv3(h, w2_ref, b2_ref) * m, 0.0)

    # fused offset | prob | cls heads: one conv into a lane-dense slab
    y = conv3(h, wh_ref, bh_ref) * m                       # (Tw, Cpad)

    # drop halo rows, fold per-level Scale() (offset lanes 0:2) and sigmoid
    # (prob lanes 2:4); cls lanes pass through.
    yk = y[halo:halo + tt, :]
    sk = scale_r[halo:halo + tt, :]
    lane = jax.lax.broadcasted_iota(jnp.int32, (1, yk.shape[-1]), 1)
    off_lane = (lane < 2).astype(jnp.float32)
    prob_lane = jnp.logical_and(lane >= 2, lane < 4)
    yk = yk * (1.0 + off_lane * (sk - 1.0))
    yk = jnp.where(prob_lane, jax.nn.sigmoid(yk), yk)
    out_ref[0] = yk.astype(out_ref.dtype)                  # dense 128-lane store


# ---------------------------------------------------------------------------
# Wrapper: single pallas_call over all FPN levels, T tiled with halos
# ---------------------------------------------------------------------------
def refine_head_forward(fpn_feats, fpn_masks, params, scales, *,
                        t_tile=512, mxu_dtype=jnp.bfloat16, out_dtype=None):
    """Mirrors RefineHead.forward (channels-last).

    fpn_feats: list of (B, T_l, Cin) f32 ; fpn_masks: list of (B, T_l) bool.
    Returns (out_offsets, out_probs, out_logits): lists of (B, T_l, .) f32.
    """
    if out_dtype is None:
        out_dtype = jnp.bfloat16 if mxu_dtype == jnp.bfloat16 else jnp.float32

    B, _, cin = fpn_feats[0].shape
    Ts = [int(f.shape[1]) for f in fpn_feats]
    t_total = int(sum(Ts))
    starts = np.cumsum([0] + Ts[:-1]).tolist()
    ends = [s + t - 1 for s, t in zip(starts, Ts)]

    fd = int(params["w1"].shape[-1])
    c2 = int(params["wc"].shape[-1])
    c_out = 2 + 2 + c2

    # lane-dense channel padding (no-op at production dims); zero-padded
    # channels stay exactly zero through the whole stack.
    cp = _round_up(cin, 128)
    fp = _round_up(fd, 128)
    c_pad = _round_up(c_out, 128)

    # T tiling: tt kept rows per grid step + 8-row halo each side (3 stacked
    # k=3 convs -> receptive field +-3; 8 keeps slices sublane-aligned).
    halo = 8
    tt = max(16, _round_up(min(t_tile, t_total), 16))
    n_tiles = pl.cdiv(t_total, tt)
    t_pad = n_tiles * tt
    tw = tt + 2 * halo

    # ---- host-side parameter prep: pad + cast weights to MXU dtype --------
    def prep_w(w, ci, co):                 # (3, ci0, co0) -> (3, ci, co)
        return jnp.pad(w, ((0, 0), (0, ci - w.shape[1]),
                           (0, co - w.shape[2]))).astype(mxu_dtype)

    def prep_b(b, co):                     # (1, co0) -> (1, co)  f32
        return jnp.pad(b, ((0, 0), (0, co - b.shape[1]))).astype(jnp.float32)

    w1 = prep_w(params["w1"], cp, fp)
    w2 = prep_w(params["w2"], fp, fp)
    wh = prep_w(jnp.concatenate([params["wo"], params["wp"], params["wc"]],
                                axis=-1), fp, c_pad)
    b1 = prep_b(params["b1"], fp)
    b2 = prep_b(params["b2"], fp)
    bh = prep_b(jnp.concatenate([params["bo"], params["bp"], params["bc"]],
                                axis=-1), c_pad)

    # ---- fuse levels along T; pad time to the tile grid, pad channels -----
    xg = jnp.concatenate(fpn_feats, axis=1).astype(jnp.float32)
    xg = jnp.pad(xg, ((0, 0), (0, t_pad - t_total), (0, cp - cin)))
    mg = jnp.concatenate([mk.astype(jnp.float32) for mk in fpn_masks], axis=1)
    mg = jnp.pad(mg, ((0, 0), (0, t_pad - t_total)))[..., None]

    # per-row aux: conv-tap validity at level seams + per-level Scale()
    prev_ok = np.ones((t_pad,), np.float32)
    next_ok = np.ones((t_pad,), np.float32)
    for s in starts:
        prev_ok[s] = 0.0               # no valid t-1 tap at a level start
    for e in ends:
        next_ok[e] = 0.0               # no valid t+1 tap at a level end
    prev_ok[t_total:] = 0.0
    next_ok[t_total:] = 0.0
    scale_row = jnp.ones((t_pad,), jnp.float32)
    for s, t, sc in zip(starts, Ts, scales):
        scale_row = scale_row.at[s:s + t].set(sc[0, 0])
    aux = jnp.stack([jnp.asarray(prev_ok), jnp.asarray(next_ok),
                     scale_row, jnp.zeros((t_pad,), jnp.float32)], axis=-1)

    # ---- overlapping (halo) windows so the T axis can be grid-tiled -------
    def windows(a):
        pad = [(0, 0)] * (a.ndim - 2) + [(halo, halo), (0, 0)]
        ap = jnp.pad(a, pad)
        win = [ap[..., i * tt:i * tt + tw, :] for i in range(n_tiles)]
        return jnp.stack(win, axis=a.ndim - 2)

    x_ov = windows(xg)            # (B, n_tiles, Tw, Cp)
    m_ov = windows(mg)            # (B, n_tiles, Tw, 1)
    aux_ov = windows(aux)         # (n_tiles, Tw, 4)

    kernel = functools.partial(refine_head_kernel,
                               roll_like_jnp=_roll_like_jnp())

    def run(single_buffer_consts):
        def const_spec(shape):
            kw = {}
            if single_buffer_consts:
                # constant index_map -> double-buffering is pure VMEM waste
                kw["pipeline_mode"] = pl.Buffered(1)
            return pl.BlockSpec(shape, lambda b, i: (0,) * len(shape), **kw)

        grid_spec = pltpu.PrefetchScalarGridSpec(
            num_scalar_prefetch=0,
            grid=(B, n_tiles),
            in_specs=[
                pl.BlockSpec((1, 1, tw, cp), lambda b, i: (b, i, 0, 0)),
                pl.BlockSpec((1, 1, tw, 1), lambda b, i: (b, i, 0, 0)),
                pl.BlockSpec((1, tw, 4), lambda b, i: (i, 0, 0)),
                const_spec((3, cp, fp)), const_spec((1, fp)),      # conv 1
                const_spec((3, fp, fp)), const_spec((1, fp)),      # conv 2
                const_spec((3, fp, c_pad)), const_spec((1, c_pad)),  # heads
            ],
            out_specs=pl.BlockSpec((1, tt, c_pad), lambda b, i: (b, i, 0)),
        )
        return pl.pallas_call(
            kernel,
            out_shape=jax.ShapeDtypeStruct((B, t_pad, c_pad), out_dtype),
            grid_spec=grid_spec,
            compiler_params=pltpu.CompilerParams(
                dimension_semantics=("parallel", "parallel"),
                vmem_limit_bytes=32 * 1024 * 1024),
        )(x_ov, m_ov, aux_ov, w1, b1, w2, b2, wh, bh)

    try:
        fused = run(True)          # constants single-buffered
    except Exception:              # fallback if pl.Buffered(1) is unsupported
        fused = run(False)

    # cheap epilogue: per-level / per-head slices (scale + sigmoid already
    # folded into the kernel), cast back to f32 for the caller.
    out_offsets, out_probs, out_logits = [], [], []
    for s, t in zip(starts, Ts):
        blk = fused[:, s:s + t].astype(jnp.float32)
        out_offsets.append(blk[:, :, 0:2])
        out_probs.append(blk[:, :, 2:4])
        out_logits.append(blk[:, :, 4:4 + c2])
    return out_offsets, out_probs, out_logits


# ---------------------------------------------------------------------------
# Pure-JAX f32 reference (for correctness check)
# ---------------------------------------------------------------------------
def _conv3_ref(x, w, b):
    xp = jnp.pad(x, ((0, 0), (1, 1), (0, 0)))
    return (jnp.einsum("btc,cf->btf", xp[:, :-2], w[0])
            + jnp.einsum("btc,cf->btf", xp[:, 1:-1], w[1])
            + jnp.einsum("btc,cf->btf", xp[:, 2:], w[2]) + b)


def refine_head_forward_ref(fpn_feats, fpn_masks, params, scales):
    offs, probs, logits = [], [], []
    for feat, mask, scale in zip(fpn_feats, fpn_masks, scales):
        m = mask.astype(jnp.float32)[..., None]
        h = jax.nn.relu(_conv3_ref(feat, params["w1"], params["b1"]) * m)
        h = jax.nn.relu(_conv3_ref(h, params["w2"], params["b2"]) * m)
        off = _conv3_ref(h, params["wo"], params["bo"]) * m
        prob = _conv3_ref(h, params["wp"], params["bp"]) * m
        logit = _conv3_ref(h, params["wc"], params["bc"]) * m
        offs.append(off * scale[0, 0])
        probs.append(jax.nn.sigmoid(prob))
        logits.append(logit)
    return offs, probs, logits


# ---------------------------------------------------------------------------
if __name__ == "__main__":
    key = jax.random.PRNGKey(0)

    # small config consistent with RefineHead(__init__)
    B = 2
    fpn_dim = 32         # input_dim of RefineHead
    head_dim = 32        # feat_dim
    num_classes = 4
    Ts = [64, 32]        # per-level sequence lengths (stride-2 FPN)
    C2 = 2 * num_classes

    keys = jax.random.split(key, 16)
    s = 0.05
    params = {
        "w1": jax.random.normal(keys[0], (3, fpn_dim, head_dim), jnp.float32) * s,
        "b1": jax.random.normal(keys[1], (1, head_dim), jnp.float32) * s,
        "w2": jax.random.normal(keys[2], (3, head_dim, head_dim), jnp.float32) * s,
        "b2": jax.random.normal(keys[3], (1, head_dim), jnp.float32) * s,
        "wo": jax.random.normal(keys[4], (3, head_dim, 2), jnp.float32) * s,
        "bo": jax.random.normal(keys[5], (1, 2), jnp.float32) * s,
        "wp": jax.random.normal(keys[6], (3, head_dim, 2), jnp.float32) * s,
        "bp": jax.random.normal(keys[7], (1, 2), jnp.float32) * s,
        "wc": jax.random.normal(keys[8], (3, head_dim, C2), jnp.float32) * s,
        "bc": jax.random.normal(keys[9], (1, C2), jnp.float32) * s,
    }
    # per-level learnable Scale() (init 1.0 in the module; distinct here)
    scales = [jnp.full((1, 1), 1.0, jnp.float32),
              jnp.full((1, 1), 1.5, jnp.float32)]

    # FPN features (B, T_l, C) and boolean masks (B, T_l)
    fpn_feats, fpn_masks = [], []
    for l, T in enumerate(Ts):
        fpn_feats.append(
            jax.random.normal(keys[10 + l], (B, T, fpn_dim), jnp.float32))
        valid_len = jnp.array([T, max(T * 3 // 4, 1)], jnp.int32)
        fpn_masks.append(jnp.arange(T)[None, :] < valid_len[:, None])

    ref = refine_head_forward_ref(fpn_feats, fpn_masks, params, scales)
    ref_flat = ref[0] + ref[1] + ref[2]

    # Two configs:
    #  * t_tile=48, bf16: production path; tile boundary falls inside level 0
    #    and the level seam inside tile 1 (exercises halo + seam handling).
    #  * t_tile=80, f32 : tighter-tolerance structural check; exercises the
    #    end-of-grid padding and a tile boundary inside level 1.
    for t_tile, dt, tol in ((48, jnp.bfloat16, 2e-2), (80, jnp.float32, 1e-2)):
        outs = refine_head_forward(fpn_feats, fpn_masks, params, scales,
                                   t_tile=t_tile, mxu_dtype=dt)
        jax.block_until_ready(outs)
        out_flat = outs[0] + outs[1] + outs[2]
        for a, b in zip(out_flat, ref_flat):
            np.testing.assert_allclose(np.asarray(a), np.asarray(b),
                                       rtol=tol, atol=tol)

    print("KERNEL_OK")
</pallas_src>

<mosaic_0001>
module attributes {stable_mosaic.version = 11 : i64} {
  func.func @probe(%arg0: memref<8x128xf32, #tpu.memory_space<vmem>>, %arg1: memref<8x128xf32, #tpu.memory_space<vmem>>) attributes {dimension_semantics = [], scalar_prefetch = 0 : i64, scratch_operands = 0 : i64, tpu.core_type = #tpu.core_type<tc>} {
    %c0 = arith.constant 0 : index
    %c0_0 = arith.constant 0 : index
    %0 = vector.load %arg0[%c0, %c0_0] : memref<8x128xf32, #tpu.memory_space<vmem>>, vector<8x128xf32>
    %c1_i32 = arith.constant 1 : i32
    %1 = tpu.dynamic_rotate %0 by %c1_i32 dim 0 : vector<8x128xf32>, i32 -> vector<8x128xf32>
    %c0_1 = arith.constant 0 : index
    %c0_2 = arith.constant 0 : index
    %2 = vector.load %arg1[%c0_1, %c0_2] : memref<8x128xf32, #tpu.memory_space<vmem>>, vector<8x128xf32>
    tpu.vector_store %arg1[%c0_1, %c0_2], %1 {strides = array<i32>} : memref<8x128xf32, #tpu.memory_space<vmem>>, vector<8x128xf32>,
    return
  }
}

</mosaic_0001>

<bundles_post_ra>
// kernel: tpu_custom_call.1
= control target key start
LH: loop header
LB: loop body
LE: loop exit
PB: predicated region body
PF: predicated region fallthrough
CT: control target
= control target key end

     0   :  { %6 = vsyncpa [#allocation3], 0  ;;  %s115_s0 = inlined_call_operand.hbm [shape: f32[8,128], index: 0, kind: input, shape index: {}]   ;;  %s116_s1 = inlined_call_operand.hbm [shape: f32[8,128], index: 1, kind: output, shape index: {}]  }
   0x1   :  { %7 = vsyncpa [#allocation4], 0  ;;  %s13_s8 = sshll.u32 %s115_s0, 4  ;;  %s97_s9 = smov [#allocation2]   ;;  %s14_s8 = int_to_ptr.hbm [resolvable:$true] %s13_s8 }
   0x2   :  { %s15_s10 = sshll.u32 %s97_s9, 4  ;;  %s16_s10 = int_to_ptr.vmem [resolvable:$true] %s15_s10 }
   0x3   :  { %18 = dma.hbm_to_vmem [thread:$0]  %s14_s8, 128, %s16_s10, [#allocation3]  }
   0x4   :  { %93 = dma.done.wait [#allocation3], 128  }
   0x5   :  { %94 = vsyncadd [#allocation3], 4294967168  ;;  %s98_s11 = smov [#allocation5]   ;;  %s33_s15 = sshll.u32 %s116_s1, 4  ;;  %v23_v0 = vld [vmem:[#allocation2] sm:$0xff]  ;;  %s34_s15 = int_to_ptr.hbm [resolvable:$true] %s33_s15 }
   0x6   :  { %s31_s12 = sshll.u32 %s98_s11, 4  ;;  %v24_v1 = vrot.slane %v23_v0, 7  ;;  %s32_s12 = int_to_ptr.vmem [resolvable:$true] %s31_s12 }
   0x8   :  { %25 = vst [vmem:[#allocation5] sm:$0xff] %v24_v1 }
   0x9   :  { %36 = dma.vmem_to_hbm [thread:$0]  %s32_s12, 128, %s34_s15, [#allocation4]  }
   0xa   :  { %95 = dma.done.wait [#allocation4], 128  }
   0xb   :  { %96 = vsyncadd [#allocation4], 4294967168 }
   0xc   :  { %41 = vsyncpa [#allocation3], 1 }
   0xd   :  { %42 = vsyncpa [#allocation4], 1 }

</bundles_post_ra>
